<compile_context>
chip_gen: v7x
topology: tpu7x:2x2x1
jax: 0.10.0
libtpu: 0.0.40
codegen_flags: <defaults>
</compile_context>

<pallas_src>
import functools
import math

import jax
import jax.numpy as jnp
from jax.experimental import pallas as pl
from jax.experimental.pallas import tpu as pltpu

PAD = 128          # lane-dense padding for hidden / action feature dims
MAX_B_TILE = 1024  # max batch rows per grid step


def _round_up(n, m):
    return ((n + m - 1) // m) * m


def _device_kind():
    try:
        return jax.devices()[0].device_kind.lower()
    except Exception:
        return ""


_KIND = _device_kind()
# v6e / v7x have bf16-capable VPU/EUP -> bf16 tanh; v5e (and older) keep f32.
_BF16_ACT = ("v6" in _KIND) or ("v7" in _KIND)
# TensorCores per device (heuristic): 2 on v7x / megacore v4 / v5p, else 1.
_N_TC = 2 if ("v7" in _KIND or "v4" in _KIND or "v5p" in _KIND) else 1


def _actor_kernel(x_ref, w_ref, b_ref, o_ref, *, num_layers, in_dim, out_size,
                  act_dtype):
    # x_ref: (b_tile, in_dim)  f32   -- states (narrow, no 128-lane inflation)
    # w_ref: (L, PAD, PAD)     bf16  -- packed weights, VMEM-resident (idx const)
    # b_ref: (>=8, PAD)        f32   -- packed biases; last row holds -BIG in
    #                                   padded action lanes (mask folded in)
    # o_ref: (b_tile, out_size) f32  -- log-probs (narrow output)
    h = x_ref[...].astype(jnp.bfloat16)
    logits = None
    for k in range(num_layers):                      # static unroll
        # First layer only needs the first `in_dim` weight rows (x is narrow);
        # remaining rows are zero padding anyway.
        w_k = w_ref[0, :in_dim, :] if k == 0 else w_ref[k]
        y = jnp.dot(h, w_k, preferred_element_type=jnp.float32) + b_ref[k:k + 1, :]
        if k < num_layers - 1:
            # bf16 tanh on v6e/v7x (bf16 EUP); f32 tanh on v5e.  Either way the
            # next MXU operand is bf16 with no extra standalone cast.
            h = jnp.tanh(y.astype(act_dtype)).astype(jnp.bfloat16)
        else:
            logits = y                                # f32

    # Padded action lanes already hold a huge negative (folded into the bias at
    # pack time), so they drop out of both the max and the logsumexp.
    m = jnp.max(logits, axis=-1, keepdims=True)
    z = logits - m
    lse = jnp.log(jnp.sum(jnp.exp(z), axis=-1, keepdims=True))
    o_ref[...] = (z - lse)[:, :out_size].astype(o_ref.dtype)


def pack_actor_params(params):
    """Pack per-layer (W_in_out, b) into one bf16 weight slab + one f32 bias
    slab.  Call ONCE at init / after each parameter update, not per forward."""
    num_layers = len(params)
    in_size = params[0][0].shape[0]
    out_size = params[-1][0].shape[1]
    widths = [in_size] + [w.shape[1] for w, _ in params]
    if max(widths) > PAD:
        raise ValueError(f"All layer widths must be <= {PAD}, got {widths}")

    w_slab = jnp.zeros((num_layers, PAD, PAD), jnp.bfloat16)
    b_slab = jnp.zeros((max(8, num_layers), PAD), jnp.float32)
    for k, (w, b) in enumerate(params):
        fi, fo = w.shape
        w_slab = w_slab.at[k, :fi, :fo].set(w.astype(jnp.bfloat16))
        b_slab = b_slab.at[k, :fo].set(b.astype(jnp.float32))

    # Fold the action-lane mask into the last layer's bias: padded weight
    # columns are zero, so padded logits become a huge (f32-safe) negative.
    neg_big = float(jnp.finfo(jnp.float32).min) / 2
    if out_size < PAD:
        b_slab = b_slab.at[num_layers - 1, out_size:].set(neg_big)

    meta = dict(num_layers=num_layers, in_size=in_size, out_size=out_size)
    return w_slab, b_slab, meta


@functools.partial(jax.jit,
                   static_argnames=("num_layers", "in_size", "out_size",
                                    "bf16_act", "n_tc"))
def _actor_forward_jit(x2, w_slab, b_slab, *, num_layers, in_size, out_size,
                       bf16_act, n_tc):
    batch = x2.shape[0]

    # Feature padding: only to a 16 multiple (bf16 sublane pack), not to 128.
    in_pad = min(PAD, _round_up(in_size, 16))

    # Adaptive batch tile: big enough to amortize per-step overhead, small
    # enough to keep >= n_tc grid steps (and to avoid padding tiny batches).
    per_core = pl.cdiv(batch, n_tc)
    b_tile = max(8, min(MAX_B_TILE, _round_up(per_core, 8)))
    b_pad = _round_up(batch, b_tile)
    grid = (b_pad // b_tile,)

    if b_pad != batch or in_pad != in_size:
        x_in = jnp.pad(x2, ((0, b_pad - batch), (0, in_pad - in_size)))
    else:
        x_in = x2

    cost = pl.CostEstimate(
        flops=2 * b_pad * num_layers * PAD * PAD,
        transcendentals=b_pad * PAD * num_layers,
        bytes_accessed=(x_in.size * 4 + w_slab.size * 2 + b_slab.size * 4
                        + b_pad * out_size * 4),
    )

    kernel = functools.partial(
        _actor_kernel, num_layers=num_layers, in_dim=in_pad, out_size=out_size,
        act_dtype=jnp.bfloat16 if bf16_act else jnp.float32)

    out = pl.pallas_call(
        kernel,
        out_shape=jax.ShapeDtypeStruct((b_pad, out_size), jnp.float32),
        grid_spec=pltpu.PrefetchScalarGridSpec(
            num_scalar_prefetch=0,
            grid=grid,
            in_specs=[
                # states: tiled over the batch grid
                pl.BlockSpec((b_tile, in_pad), lambda i: (i, 0)),
                # weights / biases: constant block index -> DMA'd once,
                # VMEM-resident across all grid steps (no re-fetch).
                pl.BlockSpec(w_slab.shape, lambda i: (0, 0, 0)),
                pl.BlockSpec(b_slab.shape, lambda i: (0, 0)),
            ],
            out_specs=pl.BlockSpec((b_tile, out_size), lambda i: (i, 0)),
        ),
        compiler_params=pltpu.CompilerParams(
            dimension_semantics=("parallel",)),
        cost_estimate=cost,
    )(x_in, w_slab, b_slab)

    return out[:batch] if b_pad != batch else out


def actor_forward(x, packed):
    """x: (input_size,) or (B, input_size) float32.
    packed: (w_slab, b_slab, meta) from pack_actor_params."""
    w_slab, b_slab, meta = packed
    single = (x.ndim == 1)
    x2 = (x[None, :] if single else x).astype(jnp.float32)
    out = _actor_forward_jit(
        x2, w_slab, b_slab,
        num_layers=meta["num_layers"], in_size=meta["in_size"],
        out_size=meta["out_size"], bf16_act=_BF16_ACT, n_tc=_N_TC)
    return out[0] if single else out


def init_linear(key, fan_in, fan_out):
    """Mimic torch.nn.Linear default init: U(-1/sqrt(fan_in), 1/sqrt(fan_in))."""
    kw, kb = jax.random.split(key)
    bound = 1.0 / math.sqrt(fan_in)
    # stored as (in, out) so the kernel computes x @ W + b
    w = jax.random.uniform(kw, (fan_in, fan_out), jnp.float32, -bound, bound)
    b = jax.random.uniform(kb, (fan_out,), jnp.float32, -bound, bound)
    return w, b


def make_actor_params(key, input_size, hidden_layers, output_size):
    sizes = [input_size] + list(hidden_layers) + [output_size]
    keys = jax.random.split(key, len(sizes) - 1)
    return [init_linear(k, sizes[i], sizes[i + 1]) for i, k in enumerate(keys)]


def actor_reference(x, params, bf16_act):
    """Pure-JAX reference mirroring the kernel's numerics (bf16 weights,
    f32 MXU accumulation, tanh in the same dtype as the kernel)."""
    act_dtype = jnp.bfloat16 if bf16_act else jnp.float32
    h = x.astype(jnp.bfloat16)
    logits = None
    for i, (w, b) in enumerate(params):
        y = jnp.dot(h, w.astype(jnp.bfloat16),
                    preferred_element_type=jnp.float32) + b.astype(jnp.float32)
        if i < len(params) - 1:
            h = jnp.tanh(y.astype(act_dtype)).astype(jnp.bfloat16)
        else:
            logits = y
    return jax.nn.log_softmax(logits, axis=-1)


if __name__ == "__main__":
    # Small shapes consistent with the module: states=16, hidden=[32, 32], actions=8
    input_size = 16
    hidden_layers = [32, 32]
    output_size = 8
    batch = 200  # non-multiple of 8 would also be fine; exercises row padding on v7x

    key = jax.random.PRNGKey(0)
    pkey, xkey = jax.random.split(key)
    params = make_actor_params(pkey, input_size, hidden_layers, output_size)
    packed = pack_actor_params(params)   # packing done ONCE, outside per-step path
    xb = jax.random.normal(xkey, (batch, input_size), jnp.float32)

    # Batched forward (one pallas_call serves all 200 states).
    log_probs = actor_forward(xb, packed)
    jax.block_until_ready(log_probs)
    assert log_probs.shape == (batch, output_size)

    # Per-row distributions sum to 1 and match the pure-JAX reference.
    sums = jnp.sum(jnp.exp(log_probs), axis=-1)
    assert bool(jnp.all(jnp.abs(sums - 1.0) < 1e-3))
    ref = actor_reference(xb, params, _BF16_ACT)
    assert bool(jnp.max(jnp.abs(log_probs - ref)) < 5e-2)

    # Single-state path (matches the PyTorch module's 1-D LogSoftmax(dim=0) use).
    x1 = xb[0]
    lp1 = actor_forward(x1, packed)
    jax.block_until_ready(lp1)
    assert lp1.shape == (output_size,)
    assert abs(float(jnp.sum(jnp.exp(lp1))) - 1.0) < 1e-3
    assert bool(jnp.max(jnp.abs(lp1 - log_probs[0])) < 1e-5)

    print("KERNEL_OK")
</pallas_src>

<mosaic_0001>
module attributes {stable_mosaic.version = 11 : i64} {
  func.func @_actor_kernel(%arg0: i32, %arg1: memref<200x16xf32, #tpu.memory_space<vmem>>, %arg2: memref<3x128x128xbf16, #tpu.memory_space<vmem>>, %arg3: memref<8x128xf32, #tpu.memory_space<vmem>>, %arg4: memref<200x8xf32, #tpu.memory_space<vmem>>) attributes {dimension_semantics = [#tpu.dimension_semantics<parallel>], iteration_bounds = array<i64: 1>, scalar_prefetch = 0 : i64, scratch_operands = 0 : i64, tpu.core_type = #tpu.core_type<tc>, window_params = [{transform_indices = @transform_0, window_bounds = array<i64: 200, 16>}, {pipeline_mode = #tpu.pipeline_mode<synchronous>, transform_indices = @transform_1, window_bounds = array<i64: 3, 128, 128>}, {pipeline_mode = #tpu.pipeline_mode<synchronous>, transform_indices = @transform_2, window_bounds = array<i64: 8, 128>}, {transform_indices = @transform_3, window_bounds = array<i64: 200, 8>}]} {
    %c0 = arith.constant 0 : index
    %c0_0 = arith.constant 0 : index
    %0 = vector.load %arg1[%c0, %c0_0] : memref<200x16xf32, #tpu.memory_space<vmem>>, vector<200x16xf32>
    %1 = arith.truncf %0 : vector<200x16xf32> to vector<200x16xbf16>
    %c0_1 = arith.constant 0 : index
    %c0_2 = arith.constant 0 : index
    %c0_3 = arith.constant 0 : index
    %2 = vector.load %arg2[%c0_1, %c0_2, %c0_3] : memref<3x128x128xbf16, #tpu.memory_space<vmem>>, vector<1x16x128xbf16>
    %3 = vector.shape_cast %2 : vector<1x16x128xbf16> to vector<16x128xbf16>
    %cst = arith.constant dense<0.000000e+00> : vector<200x128xf32>
    %4 = tpu.matmul %1, %3, %cst {dimension_numbers = #tpu.dot_dimension_numbers<[1], [0], [0], [1], [0, 0, 1, 1], [], []>} : vector<200x16xbf16>, vector<16x128xbf16>, vector<200x128xf32> -> vector<200x128xf32>
    %c0_4 = arith.constant 0 : index
    %c0_5 = arith.constant 0 : index
    %5 = vector.load %arg3[%c0_4, %c0_5] : memref<8x128xf32, #tpu.memory_space<vmem>>, vector<1x128xf32>
    %6 = vector.broadcast %5 : vector<1x128xf32> to vector<200x128xf32>
    %7 = arith.addf %4, %6 : vector<200x128xf32>
    %8 = math.tanh %7 : vector<200x128xf32>
    %9 = arith.truncf %8 : vector<200x128xf32> to vector<200x128xbf16>
    %c1 = arith.constant 1 : index
    %c0_6 = arith.constant 0 : index
    %c0_7 = arith.constant 0 : index
    %10 = vector.load %arg2[%c1, %c0_6, %c0_7] : memref<3x128x128xbf16, #tpu.memory_space<vmem>>, vector<1x128x128xbf16>
    %11 = vector.shape_cast %10 : vector<1x128x128xbf16> to vector<128x128xbf16>
    %cst_8 = arith.constant dense<0.000000e+00> : vector<200x128xf32>
    %12 = tpu.matmul %9, %11, %cst_8 {dimension_numbers = #tpu.dot_dimension_numbers<[1], [0], [0], [1], [0, 0, 1, 1], [], []>} : vector<200x128xbf16>, vector<128x128xbf16>, vector<200x128xf32> -> vector<200x128xf32>
    %c1_9 = arith.constant 1 : index
    %c0_10 = arith.constant 0 : index
    %13 = vector.load %arg3[%c1_9, %c0_10] : memref<8x128xf32, #tpu.memory_space<vmem>>, vector<1x128xf32>
    %14 = vector.broadcast %13 : vector<1x128xf32> to vector<200x128xf32>
    %15 = arith.addf %12, %14 : vector<200x128xf32>
    %16 = math.tanh %15 : vector<200x128xf32>
    %17 = arith.truncf %16 : vector<200x128xf32> to vector<200x128xbf16>
    %c2 = arith.constant 2 : index
    %c0_11 = arith.constant 0 : index
    %c0_12 = arith.constant 0 : index
    %18 = vector.load %arg2[%c2, %c0_11, %c0_12] : memref<3x128x128xbf16, #tpu.memory_space<vmem>>, vector<1x128x128xbf16>
    %19 = vector.shape_cast %18 : vector<1x128x128xbf16> to vector<128x128xbf16>
    %cst_13 = arith.constant dense<0.000000e+00> : vector<200x128xf32>
    %20 = tpu.matmul %17, %19, %cst_13 {dimension_numbers = #tpu.dot_dimension_numbers<[1], [0], [0], [1], [0, 0, 1, 1], [], []>} : vector<200x128xbf16>, vector<128x128xbf16>, vector<200x128xf32> -> vector<200x128xf32>
    %c2_14 = arith.constant 2 : index
    %c0_15 = arith.constant 0 : index
    %21 = vector.load %arg3[%c2_14, %c0_15] : memref<8x128xf32, #tpu.memory_space<vmem>>, vector<1x128xf32>
    %22 = vector.broadcast %21 : vector<1x128xf32> to vector<200x128xf32>
    %23 = arith.addf %20, %22 : vector<200x128xf32>
    %cst_16 = arith.constant dense<0xFF800000> : vector<200xf32>
    %24 = vector.multi_reduction <maximumf>, %23, %cst_16 [1] : vector<200x128xf32> to vector<200xf32>
    %25 = vector.shape_cast %24 : vector<200xf32> to vector<200x1xf32>
    %26 = vector.broadcast %25 : vector<200x1xf32> to vector<200x128xf32>
    %27 = arith.subf %23, %26 : vector<200x128xf32>
    %28 = math.exp %27 : vector<200x128xf32>
    %cst_17 = arith.constant dense<0.000000e+00> : vector<200xf32>
    %29 = vector.multi_reduction <add>, %28, %cst_17 [1] : vector<200x128xf32> to vector<200xf32>
    %30 = vector.shape_cast %29 : vector<200xf32> to vector<200x1xf32>
    %31 = math.log %30 : vector<200x1xf32>
    %32 = vector.broadcast %31 : vector<200x1xf32> to vector<200x128xf32>
    %33 = arith.subf %27, %32 : vector<200x128xf32>
    %34 = vector.extract_strided_slice %33 {offsets = [0, 0], sizes = [200, 8], strides = [1, 1]} : vector<200x128xf32> to vector<200x8xf32>
    %c0_18 = arith.constant 0 : index
    %c0_19 = arith.constant 0 : index
    %35 = vector.load %arg4[%c0_18, %c0_19] : memref<200x8xf32, #tpu.memory_space<vmem>>, vector<200x8xf32>
    tpu.vector_store %arg4[%c0_18, %c0_19], %34 {strides = array<i32>} : memref<200x8xf32, #tpu.memory_space<vmem>>, vector<200x8xf32>,
    return
  }
  func.func @transform_0(%arg0: i32) -> (i32, i32) {
    %c0_i32 = arith.constant 0 : i32
    %c0_i32_0 = arith.constant 0 : i32
    return %arg0, %c0_i32 : i32, i32
  }
  func.func @transform_1(%arg0: i32) -> (i32, i32, i32) {
    %c0_i32 = arith.constant 0 : i32
    %c0_i32_0 = arith.constant 0 : i32
    %c0_i32_1 = arith.constant 0 : i32
    %c0_i32_2 = arith.constant 0 : i32
    return %c0_i32, %c0_i32_0, %c0_i32_1 : i32, i32, i32
  }
  func.func @transform_2(%arg0: i32) -> (i32, i32) {
    %c0_i32 = arith.constant 0 : i32
    %c0_i32_0 = arith.constant 0 : i32
    %c0_i32_1 = arith.constant 0 : i32
    return %c0_i32, %c0_i32_0 : i32, i32
  }
  func.func @transform_3(%arg0: i32) -> (i32, i32) {
    %c0_i32 = arith.constant 0 : i32
    %c0_i32_0 = arith.constant 0 : i32
    return %arg0, %c0_i32 : i32, i32
  }
}

</mosaic_0001>

<bundles_post_ra>
// kernel: _actor_forward_jit.1
= control target key start
LH: loop header
LB: loop body
LE: loop exit
PB: predicated region body
PF: predicated region fallthrough
CT: control target
= control target key end

     0   :  { %v1542_v0 = vmov 0.0   ;;  %vm1543_vm0 = vmmov 0   ;;  %vm66_vm1 = vcmask 130048   ;;  %vm980_vm2 = vcmask 64512   ;;  %s2213_s1 = inlined_call_operand.vmem [shape: bf16[3,128,128], index: 1, kind: input, shape index: {}]   ;;  %s2214_s0 = inlined_call_operand.vmem [shape: f32[200,16], index: 0, kind: input, shape index: {}]   ;;  %s2215_s2 = inlined_call_operand.vmem [shape: f32[8,128], index: 2, kind: input, shape index: {}]   ;;  %s2216_s3 = inlined_call_operand.vmem [shape: f32[200,8], index: 3, kind: output, shape index: {}]  }
   0x1   :  { %1131 = vmatprep.subr.bf16.mxu0 %v1542_v0  ;;  %v1325_v1 = vld [vmem:[%s2213_s1] sm:$0xff]   ;;  %1133 = vmatprep.mubr.msk.bf16.mxu0 %vm1543_vm0, %v1542_v0  ;;  %v16_v3 = vld [vmem:[%s2214_s0 + $0x8] sm:$0xff]  ;;  %v29_v5 = vld [vmem:[%s2214_s0 + $0x70] sm:$0xff] }
   0x2   :  { %v15_v2 = vld [vmem:[%s2214_s0] sm:$0xff]  ;;  %1321 = vmatprep.subr.bf16.mxu1 %v1542_v0  ;;  %1161 = vmatprep.mubr.msk.bf16.mxu1 %vm1543_vm0, %v1542_v0  ;;  %v17_v6 = vld [vmem:[%s2214_s0 + $0x10] sm:$0xff]  ;;  %v18_v7 = vld [vmem:[%s2214_s0 + $0x18] sm:$0xff] }
   0x3   :  { %1132 = vmatpush3.bf16.msra.mxu0 %v1325_v1  ;;  %v40_v4 = vpack.c.bf16 %v16_v3, %v15_v2  ;;  %1322 = vmatpush3.bf16.msra.mxu1 %v1325_v1  ;;  %v30_v8 = vld [vmem:[%s2214_s0 + $0x78] sm:$0xff]  ;;  %v31_v10 = vld [vmem:[%s2214_s0 + $0x80] sm:$0xff]  ;;  %v41_v11 = vpack.c.bf16 %v18_v7, %v17_v6  ;;  %v32_v12 = vld [vmem:[%s2214_s0 + $0x88] sm:$0xff] }
   0x4   :  { %1185 = vmatprep.subr.bf16.mxu1 %v1542_v0  ;;  %1253 = vmatprep.subr.bf16.mxu0 %v1542_v0  ;;  %v47_v9 = vpack.c.bf16 %v30_v8, %v29_v5  ;;  %v1326_v13 = vld [vmem:[%s2213_s1 + $0x40] sm:$0xff]   ;;  %v1327_v14 = vld [vmem:[%s2213_s1 + $0x48] sm:$0xff]   ;;  %v48_v16 = vpack.c.bf16 %v32_v12, %v31_v10  ;;  %v1328_v18 = vld [vmem:[%s2213_s1 + $0x50] sm:$0xff]  }
   0x5   :  { %v19_v15 = vld [vmem:[%s2214_s0 + $0x20] sm:$0xff]  ;;  %v20_v17 = vld [vmem:[%s2214_s0 + $0x28] sm:$0xff]  ;;  %v33_v19 = vld [vmem:[%s2214_s0 + $0x90] sm:$0xff] }
   0x6   :  { %1134 = vmatmul.mubr.msk.bf16.vlgmr.msra.gmra.mrb[0].mxu0 %vm66_vm1, %v40_v4  ;;  %1162 = vmatmul.mubr.msk.bf16.vlgmr.msra.gmra.mrb[0].mxu1 %vm66_vm1, %v47_v9  ;;  %v34_v20 = vld [vmem:[%s2214_s0 + $0x98] sm:$0xff]  ;;  %v42_v21 = vpack.c.bf16 %v20_v17, %v19_v15  ;;  %v21_v24 = vld [vmem:[%s2214_s0 + $0x30] sm:$0xff]  ;;  %v1330_v26 = vld [vmem:[%s2213_s1 + $0x60] sm:$0xff]  }
   0x7   :  { %1137 = vmatprep.mubr.msk.bf16.mxu0 %vm1543_vm0, %v1542_v0  ;;  %1165 = vmatprep.mubr.msk.bf16.mxu1 %vm1543_vm0, %v1542_v0  ;;  %v1329_v22 = vld [vmem:[%s2213_s1 + $0x58] sm:$0xff]   ;;  %v49_v23 = vpack.c.bf16 %v34_v20, %v33_v19  ;;  %v35_v28 = vld [vmem:[%s2214_s0 + $0xa0] sm:$0xff]  ;;  %v36_v29 = vld [vmem:[%s2214_s0 + $0xa8] sm:$0xff] }
   0x8   :  { %1186 = vmatpush3.bf16.msra.mxu1 %v1326_v13  ;;  %v22_v25 = vld [vmem:[%s2214_s0 + $0x38] sm:$0xff]  ;;  %v50_v30 = vpack.c.bf16 %v36_v29, %v35_v28  ;;  %v23_v31 = vld [vmem:[%s2214_s0 + $0x40] sm:$0xff]  ;;  %v24_v32 = vld [vmem:[%s2214_s0 + $0x48] sm:$0xff] }
   0x9   :  { %1187 = vmatprep.subr.bf16.mxu1 %v1542_v0  ;;  %v43_v27 = vpack.c.bf16 %v22_v25, %v21_v24  ;;  %v44_v33 = vpack.c.bf16 %v24_v32, %v23_v31  ;;  %v37_v34 = vld [vmem:[%s2214_s0 + $0xb0] sm:$0xff]  ;;  %v38_v35 = vld [vmem:[%s2214_s0 + $0xb8] sm:$0xff]  ;;  %v39_v40 = vld [vmem:[%s2214_s0 + $0xc0] sm:$0xff] }
   0xa   :  { %v51_v36 = vpack.c.bf16 %v38_v35, %v37_v34  ;;  %v25_v37 = vld [vmem:[%s2214_s0 + $0x50] sm:$0xff]  ;;  %v26_v38 = vld [vmem:[%s2214_s0 + $0x58] sm:$0xff]  ;;  %v52_v41 = vpack.c.bf16 %v39_v40, %v39_v40  ;;  %v27_v42 = vld [vmem:[%s2214_s0 + $0x60] sm:$0xff] }
   0xb   :  { %v45_v39 = vpack.c.bf16 %v26_v38, %v25_v37  ;;  %v28_v43 = vld [vmem:[%s2214_s0 + $0x68] sm:$0xff]  ;;  %v1332_v46 = vld [vmem:[%s2213_s1 + $0x70] sm:$0xff]   ;;  %v1333_v47 = vld [vmem:[%s2213_s1 + $0x78] sm:$0xff]  }
   0xc   :  { %1188 = vmatpush3.bf16.msra.mxu1 %v1327_v14  ;;  %v46_v44 = vpack.c.bf16 %v28_v43, %v27_v42  ;;  %v1331_v45 = vld [vmem:[%s2213_s1 + $0x68] sm:$0xff]   ;;  %v1334_v48 = vld [vmem:[%s2213_s1 + $0x80] sm:$0xff]   ;;  %v1336_v50 = vld [vmem:[%s2213_s1 + $0x90] sm:$0xff]  }
   0xd   :  { %1189 = vmatprep.subr.bf16.mxu1 %v1542_v0  ;;  %1254 = vmatpush3.bf16.msra.mxu0 %v1334_v48  ;;  %v1335_v49 = vld [vmem:[%s2213_s1 + $0x88] sm:$0xff]   ;;  %v1337_v51 = vld [vmem:[%s2213_s1 + $0x98] sm:$0xff]   ;;  %v1738_v52 = vld [vmem:[%s2215_s2] ss:$0 sm:$0xff] }
   0xe   :  { %1138 = vmatmul.mubr.msk.bf16.gmra.mrb[4].mxu0 %vm66_vm1, %v41_v11  ;;  %1166 = vmatmul.mubr.msk.bf16.gmra.mrb[4].mxu1 %vm66_vm1, %v48_v16  ;;  %v1338_v54 = vld [vmem:[%s2213_s1 + $0xa0] sm:$0xff]   ;;  %v1339_v61 = vld [vmem:[%s2213_s1 + $0xa8] sm:$0xff]  }
   0xf   :  { %1141 = vmatprep.mubr.msk.bf16.mxu0 %vm1543_vm0, %v1542_v0  ;;  %1169 = vmatprep.mubr.msk.bf16.mxu1 %vm1543_vm0, %v1542_v0 }
  0x10   :  { %1190 = vmatpush3.bf16.msra.mxu1 %v1328_v18  ;;  %1255 = vmatprep.subr.bf16.mxu0 %v1542_v0 }
  0x11   :  { %1191 = vmatprep.subr.bf16.mxu1 %v1542_v0  ;;  %1256 = vmatpush3.bf16.msra.mxu0 %v1335_v49 }
  0x12   :  { %1257 = vmatprep.subr.bf16.mxu0 %v1542_v0 }
  0x14   :  { %1192 = vmatpush3.bf16.msra.mxu1 %v1329_v22 }
  0x15   :  { %1193 = vmatprep.subr.bf16.mxu1 %v1542_v0  ;;  %1258 = vmatpush3.bf16.msra.mxu0 %v1336_v50 }
  0x16   :  { %1142 = vmatmul.mubr.msk.bf16.gmra.mrb[8].mxu0 %vm66_vm1, %v42_v21  ;;  %1170 = vmatmul.mubr.msk.bf16.gmra.mrb[8].mxu1 %vm66_vm1, %v49_v23 }
  0x17   :  { %1145 = vmatprep.mubr.msk.bf16.mxu0 %vm1543_vm0, %v1542_v0  ;;  %1173 = vmatprep.mubr.msk.bf16.mxu1 %vm1543_vm0, %v1542_v0 }
  0x18   :  { %1194 = vmatpush3.bf16.msra.mxu1 %v1330_v26  ;;  %1259 = vmatprep.subr.bf16.mxu0 %v1542_v0 }
  0x19   :  { %1195 = vmatprep.subr.bf16.mxu1 %v1542_v0  ;;  %1260 = vmatpush3.bf16.msra.mxu0 %v1337_v51 }
  0x1a   :  { %1261 = vmatprep.subr.bf16.mxu0 %v1542_v0 }
  0x1c   :  { %1196 = vmatpush3.bf16.msra.mxu1 %v1331_v45 }
  0x1d   :  { %1197 = vmatprep.subr.bf16.mxu1 %v1542_v0  ;;  %1262 = vmatpush3.bf16.msra.mxu0 %v1338_v54 }
  0x1e   :  { %1146 = vmatmul.mubr.msk.bf16.gmra.mrb[12].mxu0 %vm66_vm1, %v43_v27  ;;  %1174 = vmatmul.mubr.msk.bf16.gmra.mrb[12].mxu1 %vm66_vm1, %v50_v30 }
  0x1f   :  { %1149 = vmatprep.mubr.msk.bf16.mxu0 %vm1543_vm0, %v1542_v0  ;;  %1177 = vmatprep.mubr.msk.bf16.mxu1 %vm1543_vm0, %v1542_v0 }
  0x20   :  { %1198 = vmatpush3.bf16.msra.mxu1 %v1332_v46  ;;  %1263 = vmatprep.subr.bf16.mxu0 %v1542_v0 }
  0x21   :  { %1199 = vmatprep.subr.bf16.mxu1 %v1542_v0  ;;  %1264 = vmatpush3.bf16.msra.mxu0 %v1339_v61 }
  0x22   :  { %1265 = vmatprep.subr.bf16.mxu0 %v1542_v0 }
  0x24   :  { %1200 = vmatpush3.bf16.msra.mxu1 %v1333_v47 }
  0x26   :  { %1150 = vmatmul.mubr.msk.bf16.gmra.mrb[16].mxu0 %vm66_vm1, %v44_v33  ;;  %1178 = vmatmul.mubr.msk.bf16.gmra.mrb[16].mxu1 %vm66_vm1, %v51_v36 }
  0x27   :  { %1153 = vmatprep.mubr.msk.bf16.mxu0 %vm1543_vm0, %v1542_v0  ;;  %1181 = vmatprep.mubr.msk.bf16.mxu1 %vm1543_vm0, %v1542_v0 }
  0x2e   :  { %1154 = vmatmul.mubr.msk.bf16.gmra.mrb[20].mxu0 %vm66_vm1, %v45_v39  ;;  %1182 = vmatmul.mubr.msk.bf16.gmra.mrb[20].mxu1 %vm66_vm1, %v52_v41 }
  0x2f   :  { %1157 = vmatprep.mubr.msk.bf16.mxu0 %vm1543_vm0, %v1542_v0  ;;  %1201 = vmatprep.mubr.msk.bf16.mxu1 %vm1543_vm0, %v1542_v0 }
  0x36   :  { %1158 = vmatmul.mubr.msk.bf16.gmra.mrb[24].mxu0 %vm66_vm1, %v46_v44 }
  0x37   :  { %1269 = vmatprep.mubr.msk.bf16.mxu0 %vm1543_vm0, %v1542_v0 }
  0xd9   :  { %v140_v53 = vpop.f32.mrb[0].mxu0  ;;  %v196_v60 = vpop.f32.mrb[0].mxu1 }
  0xda   :  { %v141_v55 = vadd.f32 %v1738_v52, %v140_v53  ;;  %v1135_v56 = vpop.f32.mrb[1].mxu0  ;;  %v197_v62 = vadd.f32 %v1738_v52, %v196_v60  ;;  %v1163_v63 = vpop.f32.mrb[1].mxu1 }
  0xdb   :  { %v143_v57 = vpop.f32.mrb[2].mxu0  ;;  %v199_v1 = vpop.f32.mrb[2].mxu1 }
  0xdc   :  { %v144_v58 = vadd.f32 %v1738_v52, %v143_v57  ;;  %v1136_v59 = vpop.f32.mrb[3].mxu0  ;;  %1342 = vtanh.f32 %v141_v55  ;;  %v200_v2 = vadd.f32 %v1738_v52, %v199_v1  ;;  %v1164_v3 = vpop.f32.mrb[3].mxu1 }
  0xde   :  { %1344 = vtanh.f32 %v144_v58 }
  0xdf   :  { %1346 = vtanh.f32 %v197_v62 }
  0xe0   :  { %1348 = vtanh.f32 %v200_v2 }
  0xe1   :  { %v148_v4 = vpop.f32.mrb[4].mxu0  ;;  %v204_v10 = vpop.f32.mrb[4].mxu1 }
  0xe2   :  { %v149_v5 = vadd.f32 %v1738_v52, %v148_v4  ;;  %v1139_v6 = vpop.f32.mrb[5].mxu0  ;;  %v205_v11 = vadd.f32 %v1738_v52, %v204_v10  ;;  %v1167_v12 = vpop.f32.mrb[5].mxu1 }
  0xe3   :  { %v151_v7 = vpop.f32.mrb[6].mxu0  ;;  %v207_v14 = vpop.f32.mrb[6].mxu1 }
  0xe4   :  { %v152_v8 = vadd.f32 %v1738_v52, %v151_v7  ;;  %v1140_v9 = vpop.f32.mrb[7].mxu0  ;;  %1350 = vtanh.f32 %v149_v5  ;;  %v208_v16 = vadd.f32 %v1738_v52, %v207_v14  ;;  %v1168_v17 = vpop.f32.mrb[7].mxu1 }
  0xe6   :  { %1352 = vtanh.f32 %v152_v8  ;;  %v1343_v13 = vpop.eup %1342 }
  0xe7   :  { %1354 = vtanh.f32 %v205_v11 }
  0xe8   :  { %v1345_v15 = vpop.eup %1344  ;;  %1356 = vtanh.f32 %v208_v16 }
  0xe9   :  { %v156_v18 = vpop.f32.mrb[8].mxu0  ;;  %v267_v19 = vpack.c.bf16 %v1345_v15, %v1343_v13  ;;  %v1757_v20 = vpop.eup %1346 }
  0xea   :  { %v157_v21 = vadd.f32 %v1738_v52, %v156_v18  ;;  %v1143_v22 = vpop.f32.mrb[9].mxu0  ;;  %v1760_v24 = vpop.eup %1348 }
  0xeb   :  { %v159_v23 = vpop.f32.mrb[10].mxu0  ;;  %1202 = vmatmul.mubr.bf16.vlgmr.msra.gmra.mrb[24].mxu1 %v267_v19  ;;  %v212_v27 = vpop.f32.mrb[8].mxu1  ;;  %v274_v28 = vpack.c.bf16 %v1760_v24, %v1757_v20 }
  0xec   :  { %v160_v25 = vadd.f32 %v1738_v52, %v159_v23  ;;  %v1144_v26 = vpop.f32.mrb[11].mxu0  ;;  %1205 = vmatprep.mubr.msk.bf16.mxu1 %vm1543_vm0, %v1542_v0  ;;  %1358 = vtanh.f32 %v157_v21  ;;  %v213_v29 = vadd.f32 %v1738_v52, %v212_v27  ;;  %v1171_v30 = vpop.f32.mrb[9].mxu1 }
  0xed   :  { %v215_v32 = vpop.f32.mrb[10].mxu1 }
  0xee   :  { %1360 = vtanh.f32 %v160_v25  ;;  %v1351_v31 = vpop.eup %1350  ;;  %v216_v34 = vadd.f32 %v1738_v52, %v215_v32  ;;  %v1172_v35 = vpop.f32.mrb[11].mxu1 }
  0xef   :  { %1362 = vtanh.f32 %v213_v29 }
  0xf0   :  { %v1353_v33 = vpop.eup %1352  ;;  %1364 = vtanh.f32 %v216_v34 }
  0xf1   :  { %v164_v36 = vpop.f32.mrb[12].mxu0  ;;  %v268_v37 = vpack.c.bf16 %v1353_v33, %v1351_v31  ;;  %v1769_v38 = vpop.eup %1354 }
  0xf2   :  { %v165_v39 = vadd.f32 %v1738_v52, %v164_v36  ;;  %v1147_v40 = vpop.f32.mrb[13].mxu0  ;;  %v1772_v42 = vpop.eup %1356 }
  0xf3   :  { %v167_v41 = vpop.f32.mrb[14].mxu0  ;;  %1206 = vmatmul.mubr.bf16.gmra.mrb[28].mxu1 %v268_v37  ;;  %v220_v45 = vpop.f32.mrb[12].mxu1  ;;  %v275_v46 = vpack.c.bf16 %v1772_v42, %v1769_v38  ;;  %v1832_v38 = vld [vmem:[%s2215_s2 + $0x1] ss:$0 sm:$0xff] }
  0xf4   :  { %v168_v43 = vadd.f32 %v1738_v52, %v167_v41  ;;  %v1148_v44 = vpop.f32.mrb[15].mxu0  ;;  %1209 = vmatprep.mubr.msk.bf16.mxu1 %vm1543_vm0, %v1542_v0  ;;  %1366 = vtanh.f32 %v165_v39  ;;  %v221_v47 = vadd.f32 %v1738_v52, %v220_v45  ;;  %v1175_v48 = vpop.f32.mrb[13].mxu1 }
  0xf5   :  { %v223_v50 = vpop.f32.mrb[14].mxu1 }
  0xf6   :  { %1368 = vtanh.f32 %v168_v43  ;;  %v1359_v49 = vpop.eup %1358  ;;  %v224_v53 = vadd.f32 %v1738_v52, %v223_v50  ;;  %v1176_v54 = vpop.f32.mrb[15].mxu1 }
  0xf7   :  { %1370 = vtanh.f32 %v221_v47 }
  0xf8   :  { %v1361_v51 = vpop.eup %1360  ;;  %1372 = vtanh.f32 %v224_v53 }
  0xf9   :  { %v172_v55 = vpop.f32.mrb[16].mxu0  ;;  %v269_v56 = vpack.c.bf16 %v1361_v51, %v1359_v49  ;;  %v1781_v57 = vpop.eup %1362 }
  0xfa   :  { %v173_v58 = vadd.f32 %v1738_v52, %v172_v55  ;;  %v1151_v59 = vpop.f32.mrb[17].mxu0  ;;  %v1784_v61 = vpop.eup %1364 }
  0xfb   :  { %v175_v60 = vpop.f32.mrb[18].mxu0  ;;  %1210 = vmatmul.mubr.bf16.gmra.mrb[32].mxu1 %v269_v56  ;;  %v228_v1 = vpop.f32.mrb[16].mxu1  ;;  %v276_v2 = vpack.c.bf16 %v1784_v61, %v1781_v57 }
  0xfc   :  { %v176_v62 = vadd.f32 %v1738_v52, %v175_v60  ;;  %v1152_v63 = vpop.f32.mrb[19].mxu0  ;;  %1213 = vmatprep.mubr.msk.bf16.mxu1 %vm1543_vm0, %v1542_v0  ;;  %1374 = vtanh.f32 %v173_v58  ;;  %v229_v3 = vadd.f32 %v1738_v52, %v228_v1  ;;  %v1179_v4 = vpop.f32.mrb[17].mxu1 }
  0xfd   :  { %v231_v6 = vpop.f32.mrb[18].mxu1 }
  0xfe   :  { %1376 = vtanh.f32 %v176_v62  ;;  %v1367_v5 = vpop.eup %1366  ;;  %v232_v8 = vadd.f32 %v1738_v52, %v231_v6  ;;  %v1180_v9 = vpop.f32.mrb[19].mxu1 }
  0xff   :  { %1378 = vtanh.f32 %v229_v3 }
 0x100   :  { %v1369_v7 = vpop.eup %1368  ;;  %1380 = vtanh.f32 %v232_v8 }
 0x101   :  { %v180_v10 = vpop.f32.mrb[20].mxu0  ;;  %v270_v11 = vpack.c.bf16 %v1369_v7, %v1367_v5  ;;  %v1371_v12 = vpop.eup %1370 }
 0x102   :  { %v181_v13 = vadd.f32 %v1738_v52, %v180_v10  ;;  %v1155_v14 = vpop.f32.mrb[21].mxu0  ;;  %v1373_v16 = vpop.eup %1372 }
 0x103   :  { %v183_v15 = vpop.f32.mrb[22].mxu0  ;;  %1214 = vmatmul.mubr.bf16.gmra.mrb[36].mxu1 %v270_v11  ;;  %v236_v19 = vpop.f32.mrb[20].mxu1  ;;  %v277_v21 = vpack.c.bf16 %v1373_v16, %v1371_v12 }
 0x104   :  { %v184_v17 = vadd.f32 %v1738_v52, %v183_v15  ;;  %v1156_v18 = vpop.f32.mrb[23].mxu0  ;;  %1217 = vmatprep.mubr.msk.bf16.mxu1 %vm1543_vm0, %v1542_v0  ;;  %1382 = vtanh.f32 %v181_v13  ;;  %v237_v22 = vadd.f32 %v1738_v52, %v236_v19  ;;  %v1183_v23 = vpop.f32.mrb[21].mxu1 }
 0x105   :  { %v239_v26 = vpop.f32.mrb[22].mxu1 }
 0x106   :  { %1384 = vtanh.f32 %v184_v17  ;;  %v1375_v25 = vpop.eup %1374  ;;  %v1184_v29 = vpop.f32.mrb[23].mxu1 }
 0x108   :  { %v1377_v27 = vpop.eup %1376 }
 0x109   :  { %v188_v30 = vpop.f32.mrb[24].mxu0  ;;  %v271_v31 = vpack.c.bf16 %v1377_v27, %v1375_v25  ;;  %v1379_v32 = vpop.eup %1378 }
 0x10a   :  { %v189_v33 = vadd.f32 %v1738_v52, %v188_v30  ;;  %v1159_v34 = vpop.f32.mrb[25].mxu0  ;;  %v1381_v36 = vpop.eup %1380 }
 0x10b   :  { %v191_v35 = vpop.f32.mrb[26].mxu0  ;;  %1218 = vmatmul.mubr.bf16.gmra.mrb[40].mxu1 %v271_v31  ;;  %v278_v40 = vpack.c.bf16 %v1381_v36, %v1379_v32 }
 0x10c   :  { %v192_v37 = vadd.f32 %v1738_v52, %v191_v35  ;;  %v1160_v39 = vpop.f32.mrb[27].mxu0  ;;  %1221 = vmatprep.mubr.msk.bf16.mxu1 %vm1543_vm0, %v1542_v0  ;;  %1386 = vtanh.f32 %v189_v33  ;;  %v1340_v52 = vld [vmem:[%s2213_s1 + $0xb0] sm:$0xff]  }
 0x10d   :  { %1266 = vmatpush3.bf16.msra.mxu0 %v1340_v52 }
 0x10e   :  { %1388 = vtanh.f32 %v192_v37  ;;  %v1383_v41 = vpop.eup %1382  ;;  %1267 = vmatprep.subr.bf16.mxu0 %v1542_v0 }
 0x10f   :  { %1390 = vtanh.f32 %v237_v22 }
 0x110   :  { %v1385_v43 = vpop.eup %1384 }
 0x111   :  { %v272_v44 = vpack.c.bf16 %v1385_v43, %v1383_v41 }
 0x113   :  { %1222 = vmatmul.mubr.bf16.gmra.mrb[44].mxu1 %v272_v44 }
 0x114   :  { %1225 = vmatprep.mubr.msk.bf16.mxu1 %vm1543_vm0, %v1542_v0 }
 0x116   :  { %v1387_v45 = vpop.eup %1386 }
 0x118   :  { %v1389_v47 = vpop.eup %1388 }
 0x119   :  { %v273_v48 = vpack.c.bf16 %v1389_v47, %v1387_v45  ;;  %v1391_v20 = vpop.eup %1390 }
 0x11a   :  { %v279_v24 = vpack.c.bf16 %v1391_v20, %v1391_v20 }
 0x11b   :  { %1226 = vmatmul.mubr.bf16.gmra.mrb[48].mxu1 %v273_v48 }
 0x11c   :  { %1229 = vmatprep.mubr.msk.bf16.mxu1 %vm1543_vm0, %v1542_v0 }
 0x123   :  { %1230 = vmatmul.mubr.bf16.gmra.mrb[52].mxu1 %v274_v28  ;;  %v1341_v28 = vld [vmem:[%s2213_s1 + $0xb8] sm:$0xff]  }
 0x124   :  { %1233 = vmatprep.mubr.msk.bf16.mxu1 %vm1543_vm0, %v1542_v0  ;;  %1268 = vmatpush3.bf16.msra.mxu0 %v1341_v28 }
 0x12b   :  { %1234 = vmatmul.mubr.bf16.gmra.mrb[56].mxu1 %v275_v46 }
 0x12c   :  { %1237 = vmatprep.mubr.msk.bf16.mxu1 %vm1543_vm0, %v1542_v0 }
 0x133   :  { %1238 = vmatmul.mubr.bf16.gmra.mrb[60].mxu1 %v276_v2 }
 0x134   :  { %1241 = vmatprep.mubr.msk.bf16.mxu1 %vm1543_vm0, %v1542_v0 }
 0x13b   :  { %1242 = vmatmul.mubr.bf16.gmra.mrb[64].mxu1 %v277_v21 }
 0x13c   :  { %1245 = vmatprep.mubr.msk.bf16.mxu1 %vm1543_vm0, %v1542_v0 }
 0x143   :  { %1246 = vmatmul.mubr.bf16.gmra.mrb[68].mxu1 %v278_v40 }
 0x144   :  { %1249 = vmatprep.mubr.msk.bf16.mxu1 %vm1543_vm0, %v1542_v0 }
 0x14b   :  { %1250 = vmatmul.mubr.bf16.gmra.mrb[72].mxu1 %v279_v24 }
 0x1be   :  { %v384_v42 = vpop.f32.mrb[24].mxu1 }
 0x1bf   :  { %v385_v46 = vadd.f32 %v1832_v38, %v384_v42  ;;  %v1203_v49 = vpop.f32.mrb[25].mxu1 }
 0x1c0   :  { %v387_v50 = vpop.f32.mrb[26].mxu1 }
 0x1c1   :  { %v388_v51 = vadd.f32 %v1832_v38, %v387_v50  ;;  %v1204_v53 = vpop.f32.mrb[27].mxu1  ;;  %1392 = vtanh.f32 %v385_v46 }
 0x1c3   :  { %1394 = vtanh.f32 %v388_v51 }
 0x1c6   :  { %v392_v54 = vpop.f32.mrb[28].mxu1 }
 0x1c7   :  { %v393_v55 = vadd.f32 %v1832_v38, %v392_v54  ;;  %v1207_v56 = vpop.f32.mrb[29].mxu1 }
 0x1c8   :  { %v395_v57 = vpop.f32.mrb[30].mxu1 }
 0x1c9   :  { %v396_v58 = vadd.f32 %v1832_v38, %v395_v57  ;;  %v1208_v59 = vpop.f32.mrb[31].mxu1  ;;  %1396 = vtanh.f32 %v393_v55 }
 0x1cb   :  { %1398 = vtanh.f32 %v396_v58  ;;  %v1393_v60 = vpop.eup %1392 }
 0x1cd   :  { %v1395_v61 = vpop.eup %1394 }
 0x1ce   :  { %v400_v62 = vpop.f32.mrb[32].mxu1  ;;  %v511_v63 = vpack.c.bf16 %v1395_v61, %v1393_v60 }
 0x1cf   :  { %v401_v1 = vadd.f32 %v1832_v38, %v400_v62  ;;  %v1211_v2 = vpop.f32.mrb[33].mxu1 }
 0x1d0   :  { %v403_v3 = vpop.f32.mrb[34].mxu1  ;;  %1270 = vmatmul.mubr.bf16.vlgmr.msra.gmra.mrb[28].mxu0 %v511_v63 }
 0x1d1   :  { %v404_v4 = vadd.f32 %v1832_v38, %v403_v3  ;;  %v1212_v5 = vpop.f32.mrb[35].mxu1  ;;  %1273 = vmatprep.mubr.msk.bf16.mxu0 %vm1543_vm0, %v1542_v0  ;;  %1400 = vtanh.f32 %v401_v1 }
 0x1d3   :  { %1402 = vtanh.f32 %v404_v4  ;;  %v1397_v6 = vpop.eup %1396 }
 0x1d5   :  { %v1399_v7 = vpop.eup %1398 }
 0x1d6   :  { %v408_v8 = vpop.f32.mrb[36].mxu1  ;;  %v512_v9 = vpack.c.bf16 %v1399_v7, %v1397_v6 }
 0x1d7   :  { %v409_v10 = vadd.f32 %v1832_v38, %v408_v8  ;;  %v1215_v11 = vpop.f32.mrb[37].mxu1 }
 0x1d8   :  { %v411_v12 = vpop.f32.mrb[38].mxu1  ;;  %1274 = vmatmul.mubr.bf16.gmra.mrb[32].mxu0 %v512_v9 }
 0x1d9   :  { %v412_v13 = vadd.f32 %v1832_v38, %v411_v12  ;;  %v1216_v14 = vpop.f32.mrb[39].mxu1  ;;  %1277 = vmatprep.mubr.msk.bf16.mxu0 %vm1543_vm0, %v1542_v0  ;;  %1404 = vtanh.f32 %v409_v10 }
 0x1db   :  { %1406 = vtanh.f32 %v412_v13  ;;  %v1401_v15 = vpop.eup %1400 }
 0x1dd   :  { %v1403_v16 = vpop.eup %1402 }
 0x1de   :  { %v416_v17 = vpop.f32.mrb[40].mxu1  ;;  %v513_v18 = vpack.c.bf16 %v1403_v16, %v1401_v15 }
 0x1df   :  { %v417_v19 = vadd.f32 %v1832_v38, %v416_v17  ;;  %v1219_v21 = vpop.f32.mrb[41].mxu1 }
 0x1e0   :  { %v419_v22 = vpop.f32.mrb[42].mxu1  ;;  %1278 = vmatmul.mubr.bf16.gmra.mrb[36].mxu0 %v513_v18 }
 0x1e1   :  { %v420_v23 = vadd.f32 %v1832_v38, %v419_v22  ;;  %v1220_v25 = vpop.f32.mrb[43].mxu1  ;;  %1281 = vmatprep.mubr.msk.bf16.mxu0 %vm1543_vm0, %v1542_v0  ;;  %1408 = vtanh.f32 %v417_v19 }
 0x1e3   :  { %1410 = vtanh.f32 %v420_v23  ;;  %v1405_v26 = vpop.eup %1404 }
 0x1e5   :  { %v1407_v27 = vpop.eup %1406 }
 0x1e6   :  { %v424_v29 = vpop.f32.mrb[44].mxu1  ;;  %v514_v30 = vpack.c.bf16 %v1407_v27, %v1405_v26 }
 0x1e7   :  { %v425_v31 = vadd.f32 %v1832_v38, %v424_v29  ;;  %v1223_v32 = vpop.f32.mrb[45].mxu1 }
 0x1e8   :  { %v427_v33 = vpop.f32.mrb[46].mxu1  ;;  %1282 = vmatmul.mubr.bf16.gmra.mrb[40].mxu0 %v514_v30 }
 0x1e9   :  { %v428_v34 = vadd.f32 %v1832_v38, %v427_v33  ;;  %v1224_v35 = vpop.f32.mrb[47].mxu1  ;;  %1285 = vmatprep.mubr.msk.bf16.mxu0 %vm1543_vm0, %v1542_v0  ;;  %1412 = vtanh.f32 %v425_v31 }
 0x1eb   :  { %1414 = vtanh.f32 %v428_v34  ;;  %v1409_v36 = vpop.eup %1408 }
 0x1ed   :  { %v1411_v37 = vpop.eup %1410 }
 0x1ee   :  { %v432_v39 = vpop.f32.mrb[48].mxu1  ;;  %v515_v40 = vpack.c.bf16 %v1411_v37, %v1409_v36 }
 0x1ef   :  { %v433_v41 = vadd.f32 %v1832_v38, %v432_v39  ;;  %v1227_v43 = vpop.f32.mrb[49].mxu1 }
 0x1f0   :  { %v435_v44 = vpop.f32.mrb[50].mxu1  ;;  %1286 = vmatmul.mubr.bf16.gmra.mrb[44].mxu0 %v515_v40 }
 0x1f1   :  { %v436_v45 = vadd.f32 %v1832_v38, %v435_v44  ;;  %v1228_v47 = vpop.f32.mrb[51].mxu1  ;;  %1289 = vmatprep.mubr.msk.bf16.mxu0 %vm1543_vm0, %v1542_v0  ;;  %1416 = vtanh.f32 %v433_v41 }
 0x1f3   :  { %1418 = vtanh.f32 %v436_v45  ;;  %v1413_v48 = vpop.eup %1412 }
 0x1f5   :  { %v1415_v52 = vpop.eup %1414 }
 0x1f6   :  { %v440_v20 = vpop.f32.mrb[52].mxu1  ;;  %v516_v24 = vpack.c.bf16 %v1415_v52, %v1413_v48 }
 0x1f7   :  { %v441_v28 = vadd.f32 %v1832_v38, %v440_v20  ;;  %v1231_v42 = vpop.f32.mrb[53].mxu1 }
 0x1f8   :  { %v443_v46 = vpop.f32.mrb[54].mxu1  ;;  %1290 = vmatmul.mubr.bf16.gmra.mrb[48].mxu0 %v516_v24 }
 0x1f9   :  { %v444_v49 = vadd.f32 %v1832_v38, %v443_v46  ;;  %v1232_v50 = vpop.f32.mrb[55].mxu1  ;;  %1293 = vmatprep.mubr.msk.bf16.mxu0 %vm1543_vm0, %v1542_v0  ;;  %1420 = vtanh.f32 %v441_v28 }
 0x1fb   :  { %1422 = vtanh.f32 %v444_v49  ;;  %v1417_v51 = vpop.eup %1416 }
 0x1fd   :  { %v1419_v53 = vpop.eup %1418 }
 0x1fe   :  { %v448_v54 = vpop.f32.mrb[56].mxu1  ;;  %v517_v55 = vpack.c.bf16 %v1419_v53, %v1417_v51 }
 0x1ff   :  { %v449_v56 = vadd.f32 %v1832_v38, %v448_v54  ;;  %v1235_v57 = vpop.f32.mrb[57].mxu1 }
 0x200   :  { %v451_v58 = vpop.f32.mrb[58].mxu1  ;;  %1294 = vmatmul.mubr.bf16.gmra.mrb[52].mxu0 %v517_v55 }
 0x201   :  { %v452_v59 = vadd.f32 %v1832_v38, %v451_v58  ;;  %v1236_v60 = vpop.f32.mrb[59].mxu1  ;;  %1297 = vmatprep.mubr.msk.bf16.mxu0 %vm1543_vm0, %v1542_v0  ;;  %1424 = vtanh.f32 %v449_v56 }
 0x203   :  { %1426 = vtanh.f32 %v452_v59  ;;  %v1421_v61 = vpop.eup %1420 }
 0x205   :  { %v1423_v62 = vpop.eup %1422 }
 0x206   :  { %v456_v63 = vpop.f32.mrb[60].mxu1  ;;  %v518_v1 = vpack.c.bf16 %v1423_v62, %v1421_v61 }
 0x207   :  { %v457_v2 = vadd.f32 %v1832_v38, %v456_v63  ;;  %v1239_v3 = vpop.f32.mrb[61].mxu1 }
 0x208   :  { %v459_v4 = vpop.f32.mrb[62].mxu1  ;;  %1298 = vmatmul.mubr.bf16.gmra.mrb[56].mxu0 %v518_v1 }
 0x209   :  { %v460_v5 = vadd.f32 %v1832_v38, %v459_v4  ;;  %v1240_v6 = vpop.f32.mrb[63].mxu1  ;;  %1301 = vmatprep.mubr.msk.bf16.mxu0 %vm1543_vm0, %v1542_v0  ;;  %1428 = vtanh.f32 %v457_v2 }
 0x20b   :  { %1430 = vtanh.f32 %v460_v5  ;;  %v1425_v7 = vpop.eup %1424 }
 0x20d   :  { %v1427_v8 = vpop.eup %1426 }
 0x20e   :  { %v464_v9 = vpop.f32.mrb[64].mxu1  ;;  %v519_v10 = vpack.c.bf16 %v1427_v8, %v1425_v7 }
 0x20f   :  { %v465_v11 = vadd.f32 %v1832_v38, %v464_v9  ;;  %v1243_v12 = vpop.f32.mrb[65].mxu1 }
 0x210   :  { %v467_v13 = vpop.f32.mrb[66].mxu1  ;;  %1302 = vmatmul.mubr.bf16.gmra.mrb[60].mxu0 %v519_v10 }
 0x211   :  { %v468_v14 = vadd.f32 %v1832_v38, %v467_v13  ;;  %v1244_v15 = vpop.f32.mrb[67].mxu1  ;;  %1305 = vmatprep.mubr.msk.bf16.mxu0 %vm1543_vm0, %v1542_v0  ;;  %1432 = vtanh.f32 %v465_v11 }
 0x213   :  { %1434 = vtanh.f32 %v468_v14  ;;  %v1429_v16 = vpop.eup %1428 }
 0x215   :  { %v1431_v17 = vpop.eup %1430 }
 0x216   :  { %v472_v18 = vpop.f32.mrb[68].mxu1  ;;  %v520_v19 = vpack.c.bf16 %v1431_v17, %v1429_v16 }
 0x217   :  { %v473_v21 = vadd.f32 %v1832_v38, %v472_v18  ;;  %v1247_v22 = vpop.f32.mrb[69].mxu1 }
 0x218   :  { %v475_v23 = vpop.f32.mrb[70].mxu1  ;;  %1306 = vmatmul.mubr.bf16.gmra.mrb[64].mxu0 %v520_v19 }
 0x219   :  { %v476_v25 = vadd.f32 %v1832_v38, %v475_v23  ;;  %v1248_v26 = vpop.f32.mrb[71].mxu1  ;;  %1309 = vmatprep.mubr.msk.bf16.mxu0 %vm1543_vm0, %v1542_v0  ;;  %1436 = vtanh.f32 %v473_v21 }
 0x21b   :  { %1438 = vtanh.f32 %v476_v25  ;;  %v1433_v27 = vpop.eup %1432 }
 0x21d   :  { %v1435_v29 = vpop.eup %1434 }
 0x21e   :  { %v480_v30 = vpop.f32.mrb[72].mxu1  ;;  %v521_v31 = vpack.c.bf16 %v1435_v29, %v1433_v27 }
 0x21f   :  { %v481_v32 = vadd.f32 %v1832_v38, %v480_v30  ;;  %v1251_v33 = vpop.f32.mrb[73].mxu1  ;;  %v1886_v38 = vld [vmem:[%s2215_s2 + $0x2] ss:$0 sm:$0xff] }
 0x220   :  { %v483_v34 = vpop.f32.mrb[74].mxu1  ;;  %1310 = vmatmul.mubr.bf16.gmra.mrb[68].mxu0 %v521_v31 }
 0x221   :  { %1440 = vtanh.f32 %v481_v32  ;;  %v1252_v35 = vpop.f32.mrb[75].mxu1  ;;  %1313 = vmatprep.mubr.msk.bf16.mxu0 %vm1543_vm0, %v1542_v0 }
 0x223   :  { %v1437_v36 = vpop.eup %1436 }
 0x225   :  { %v1439_v37 = vpop.eup %1438 }
 0x226   :  { %v522_v39 = vpack.c.bf16 %v1439_v37, %v1437_v36 }
 0x228   :  { %1314 = vmatmul.mubr.bf16.gmra.mrb[72].mxu0 %v522_v39 }
 0x229   :  { %1317 = vmatprep.mubr.msk.bf16.mxu0 %vm1543_vm0, %v1542_v0 }
 0x22b   :  { %v1441_v40 = vpop.eup %1440 }
 0x22c   :  { %v523_v41 = vpack.c.bf16 %v1441_v40, %v1441_v40 }
 0x230   :  { %1318 = vmatmul.mubr.bf16.gmra.mrb[76].mxu0 %v523_v41 }
 0x2a3   :  { %v628_v43 = vpop.f32.mrb[28].mxu0 }
 0x2a4   :  { %v1889_v44 = vadd.f32 %v1886_v38, %v628_v43  ;;  %v1271_v45 = vpop.f32.mrb[29].mxu0 }
 0x2a5   :  { %v631_v47 = vpop.f32.mrb[30].mxu0 }
 0x2a6   :  { %730 = vmax.xlane.f32.xlu0 %v1889_v44  ;;  %v1272_v48 = vpop.f32.mrb[31].mxu0  ;;  %v1893_v52 = vadd.f32 %v1886_v38, %v631_v47 }
 0x2aa   :  { %732 = vmax.xlane.f32.xlu0 %v1893_v52 }
 0x2ab   :  { %v636_v0 = vpop.f32.mrb[32].mxu0 }
 0x2ac   :  { %v1897_v20 = vadd.f32 %v1886_v38, %v636_v0  ;;  %v1275_v24 = vpop.f32.mrb[33].mxu0 }
 0x2ad   :  { %v639_v28 = vpop.f32.mrb[34].mxu0 }
 0x2ae   :  { %734 = vmax.xlane.f32.xlu1 %v1897_v20  ;;  %v1276_v42 = vpop.f32.mrb[35].mxu0  ;;  %v1901_v46 = vadd.f32 %v1886_v38, %v639_v28 }
 0x2b2   :  { %736 = vmax.xlane.f32.xlu1 %v1901_v46 }
 0x2b3   :  { %v644_v49 = vpop.f32.mrb[36].mxu0 }
 0x2b4   :  { %v1905_v50 = vadd.f32 %v1886_v38, %v644_v49  ;;  %v1279_v51 = vpop.f32.mrb[37].mxu0 }
 0x2b5   :  { %v647_v53 = vpop.f32.mrb[38].mxu0 }
 0x2b6   :  { %v1908_v54 = vadd.f32 %v1886_v38, %v647_v53  ;;  %738 = vmax.xlane.f32.xlu0 %v1905_v50  ;;  %v1280_v55 = vpop.f32.mrb[39].mxu0 }
 0x2b8   :  { %740 = vmax.xlane.f32.xlu1 %v1908_v54 }
 0x2bb   :  { %v652_v56 = vpop.f32.mrb[40].mxu0 }
 0x2bc   :  { %v1913_v57 = vadd.f32 %v1886_v38, %v652_v56  ;;  %v1283_v58 = vpop.f32.mrb[41].mxu0 }
 0x2bd   :  { %v655_v59 = vpop.f32.mrb[42].mxu0 }
 0x2be   :  { %v1916_v60 = vadd.f32 %v1886_v38, %v655_v59  ;;  %742 = vmax.xlane.f32.xlu0 %v1913_v57  ;;  %v1284_v61 = vpop.f32.mrb[43].mxu0 }
 0x2c0   :  { %744 = vmax.xlane.f32.xlu1 %v1916_v60 }
 0x2c3   :  { %v660_v62 = vpop.f32.mrb[44].mxu0 }
 0x2c4   :  { %v1921_v63 = vadd.f32 %v1886_v38, %v660_v62  ;;  %v1287_v1 = vpop.f32.mrb[45].mxu0 }
 0x2c5   :  { %v663_v2 = vpop.f32.mrb[46].mxu0 }
 0x2c6   :  { %v1924_v3 = vadd.f32 %v1886_v38, %v663_v2  ;;  %746 = vmax.xlane.f32.xlu0 %v1921_v63  ;;  %v1288_v4 = vpop.f32.mrb[47].mxu0 }
 0x2c8   :  { %748 = vmax.xlane.f32.xlu1 %v1924_v3 }
 0x2cb   :  { %v668_v5 = vpop.f32.mrb[48].mxu0 }
 0x2cc   :  { %v1929_v6 = vadd.f32 %v1886_v38, %v668_v5  ;;  %v1291_v7 = vpop.f32.mrb[49].mxu0 }
 0x2cd   :  { %v671_v8 = vpop.f32.mrb[50].mxu0 }
 0x2ce   :  { %v1932_v9 = vadd.f32 %v1886_v38, %v671_v8  ;;  %750 = vmax.xlane.f32.xlu0 %v1929_v6  ;;  %v1292_v10 = vpop.f32.mrb[51].mxu0 }
 0x2d0   :  { %752 = vmax.xlane.f32.xlu1 %v1932_v9 }
 0x2d3   :  { %v676_v11 = vpop.f32.mrb[52].mxu0 }
 0x2d4   :  { %v1937_v12 = vadd.f32 %v1886_v38, %v676_v11  ;;  %v1295_v13 = vpop.f32.mrb[53].mxu0 }
 0x2d5   :  { %v679_v14 = vpop.f32.mrb[54].mxu0 }
 0x2d6   :  { %v1940_v15 = vadd.f32 %v1886_v38, %v679_v14  ;;  %754 = vmax.xlane.f32.xlu0 %v1937_v12  ;;  %v1296_v16 = vpop.f32.mrb[55].mxu0 }
 0x2d8   :  { %756 = vmax.xlane.f32.xlu1 %v1940_v15 }
 0x2db   :  { %v684_v17 = vpop.f32.mrb[56].mxu0 }
 0x2dc   :  { %v1945_v18 = vadd.f32 %v1886_v38, %v684_v17  ;;  %v1299_v19 = vpop.f32.mrb[57].mxu0 }
 0x2dd   :  { %v687_v21 = vpop.f32.mrb[58].mxu0 }
 0x2de   :  { %v1948_v22 = vadd.f32 %v1886_v38, %v687_v21  ;;  %758 = vmax.xlane.f32.xlu0 %v1945_v18  ;;  %v1300_v23 = vpop.f32.mrb[59].mxu0 }
 0x2e0   :  { %760 = vmax.xlane.f32.xlu1 %v1948_v22 }
 0x2e3   :  { %v692_v25 = vpop.f32.mrb[60].mxu0 }
 0x2e4   :  { %v1953_v26 = vadd.f32 %v1886_v38, %v692_v25  ;;  %v1303_v27 = vpop.f32.mrb[61].mxu0 }
 0x2e5   :  { %v695_v29 = vpop.f32.mrb[62].mxu0 }
 0x2e6   :  { %v1956_v30 = vadd.f32 %v1886_v38, %v695_v29  ;;  %762 = vmax.xlane.f32.xlu0 %v1953_v26  ;;  %v1304_v31 = vpop.f32.mrb[63].mxu0 }
 0x2e8   :  { %764 = vmax.xlane.f32.xlu1 %v1956_v30 }
 0x2eb   :  { %v700_v32 = vpop.f32.mrb[64].mxu0 }
 0x2ec   :  { %v1961_v33 = vadd.f32 %v1886_v38, %v700_v32  ;;  %v1307_v34 = vpop.f32.mrb[65].mxu0 }
 0x2ed   :  { %v703_v35 = vpop.f32.mrb[66].mxu0 }
 0x2ee   :  { %v1964_v36 = vadd.f32 %v1886_v38, %v703_v35  ;;  %766 = vmax.xlane.f32.xlu0 %v1961_v33  ;;  %v1308_v37 = vpop.f32.mrb[67].mxu0 }
 0x2f0   :  { %768 = vmax.xlane.f32.xlu1 %v1964_v36 }
 0x2f3   :  { %v708_v39 = vpop.f32.mrb[68].mxu0 }
 0x2f4   :  { %v1969_v40 = vadd.f32 %v1886_v38, %v708_v39  ;;  %v1311_v41 = vpop.f32.mrb[69].mxu0 }
 0x2f5   :  { %v711_v43 = vpop.f32.mrb[70].mxu0 }
 0x2f6   :  { %v1972_v45 = vadd.f32 %v1886_v38, %v711_v43  ;;  %770 = vmax.xlane.f32.xlu0 %v1969_v40  ;;  %v1312_v47 = vpop.f32.mrb[71].mxu0 }
 0x2f8   :  { %772 = vmax.xlane.f32.xlu1 %v1972_v45 }
 0x2fb   :  { %v716_v48 = vpop.f32.mrb[72].mxu0 }
 0x2fc   :  { %v1977_v0 = vadd.f32 %v1886_v38, %v716_v48  ;;  %v1315_v24 = vpop.f32.mrb[73].mxu0 }
 0x2fd   :  { %v719_v28 = vpop.f32.mrb[74].mxu0 }
 0x2fe   :  { %v1980_v42 = vadd.f32 %v1886_v38, %v719_v28  ;;  %774 = vmax.xlane.f32.xlu0 %v1977_v0  ;;  %v1316_v49 = vpop.f32.mrb[75].mxu0 }
 0x300   :  { %776 = vmax.xlane.f32.xlu1 %v1980_v42 }
 0x303   :  { %v724_v51 = vpop.f32.mrb[76].mxu0 }
 0x304   :  { %v1985_v53 = vadd.f32 %v1886_v38, %v724_v51  ;;  %v1319_v55 = vpop.f32.mrb[77].mxu0 }
 0x305   :  { %v727_v56 = vpop.f32.mrb[78].mxu0 }
 0x306   :  { %778 = vmax.xlane.f32.xlu0 %v1985_v53  ;;  %v1320_v58 = vpop.f32.mrb[79].mxu0 }
 0x333   :  { %v731_v59 = vpop.xlane.xlu0 %730 }
 0x334   :  { %v1989_v61 = vsub.f32 %v1889_v44, %v731_v59 }
 0x336   :  { %v805_v62 = vmul.f32 1.442695, %v1989_v61 }
 0x337   :  { %v733_v1 = vpop.xlane.xlu0 %732 }
 0x338   :  { %1442 = vpow2.f32 %v805_v62  ;;  %v1993_v2 = vsub.f32 %v1893_v52, %v733_v1 }
 0x33a   :  { %v807_v4 = vmul.f32 1.442695, %v1993_v2 }
 0x33b   :  { %v735_v38 = vpop.xlane.xlu1 %734 }
 0x33c   :  { %1444 = vpow2.f32 %v807_v4  ;;  %v1997_v5 = vsub.f32 %v1897_v20, %v735_v38 }
 0x33e   :  { %v809_v7 = vmul.f32 1.442695, %v1997_v5 }
 0x33f   :  { %v737_v8 = vpop.xlane.xlu1 %736 }
 0x340   :  { %1446 = vpow2.f32 %v809_v7  ;;  %v2001_v44 = vsub.f32 %v1901_v46, %v737_v8 }
 0x342   :  { %v1443_v10 = vpop.eup %1442  ;;  %v811_v11 = vmul.f32 1.442695, %v2001_v44 }
 0x343   :  { %v739_v13 = vpop.xlane.xlu0 %738  ;;  %855 = vadd.xlane.f32.xlu1 %v1443_v10 }
 0x344   :  { %1448 = vpow2.f32 %v811_v11  ;;  %v2005_v52 = vsub.f32 %v1905_v50, %v739_v13 }
 0x345   :  { %v741_v14 = vpop.xlane.xlu1 %740 }
 0x346   :  { %v1445_v16 = vpop.eup %1444  ;;  %v813_v20 = vmul.f32 1.442695, %v2005_v52  ;;  %v2009_v17 = vsub.f32 %v1908_v54, %v741_v14 }
 0x347   :  { %857 = vadd.xlane.f32.xlu0 %v1445_v16 }
 0x348   :  { %1450 = vpow2.f32 %v813_v20  ;;  %v815_v46 = vmul.f32 1.442695, %v2009_v17 }
 0x34a   :  { %v1447_v19 = vpop.eup %1446  ;;  %1452 = vpow2.f32 %v815_v46 }
 0x34b   :  { %v743_v21 = vpop.xlane.xlu0 %742  ;;  %859 = vadd.xlane.f32.xlu1 %v1447_v19 }
 0x34c   :  { %v2013_v23 = vsub.f32 %v1913_v57, %v743_v21 }
 0x34d   :  { %v745_v50 = vpop.xlane.xlu1 %744 }
 0x34e   :  { %v1449_v25 = vpop.eup %1448  ;;  %v817_v27 = vmul.f32 1.442695, %v2013_v23  ;;  %v2017_v29 = vsub.f32 %v1916_v60, %v745_v50 }
 0x34f   :  { %861 = vadd.xlane.f32.xlu0 %v1449_v25 }
 0x350   :  { %1454 = vpow2.f32 %v817_v27  ;;  %v819_v54 = vmul.f32 1.442695, %v2017_v29 }
 0x352   :  { %v1451_v31 = vpop.eup %1450  ;;  %1456 = vpow2.f32 %v819_v54 }
 0x353   :  { %v747_v32 = vpop.xlane.xlu0 %746  ;;  %863 = vadd.xlane.f32.xlu1 %v1451_v31 }
 0x354   :  { %v1453_v34 = vpop.eup %1452  ;;  %v2021_v35 = vsub.f32 %v1921_v63, %v747_v32 }
 0x355   :  { %v749_v57 = vpop.xlane.xlu1 %748  ;;  %865 = vadd.xlane.f32.xlu0 %v1453_v34 }
 0x356   :  { %v821_v37 = vmul.f32 1.442695, %v2021_v35  ;;  %v2025_v39 = vsub.f32 %v1924_v3, %v749_v57 }
 0x358   :  { %1458 = vpow2.f32 %v821_v37  ;;  %v823_v60 = vmul.f32 1.442695, %v2025_v39 }
 0x35a   :  { %v1455_v41 = vpop.eup %1454  ;;  %1460 = vpow2.f32 %v823_v60 }
 0x35b   :  { %v751_v43 = vpop.xlane.xlu0 %750  ;;  %867 = vadd.xlane.f32.xlu1 %v1455_v41 }
 0x35c   :  { %v1457_v47 = vpop.eup %1456  ;;  %v2029_v48 = vsub.f32 %v1929_v6, %v751_v43 }
 0x35d   :  { %v753_v63 = vpop.xlane.xlu1 %752  ;;  %869 = vadd.xlane.f32.xlu0 %v1457_v47 }
 0x35e   :  { %v825_v24 = vmul.f32 1.442695, %v2029_v48  ;;  %v2033_v28 = vsub.f32 %v1932_v9, %v753_v63 }
 0x360   :  { %1462 = vpow2.f32 %v825_v24  ;;  %v827_v3 = vmul.f32 1.442695, %v2033_v28 }
 0x362   :  { %v1459_v49 = vpop.eup %1458  ;;  %1464 = vpow2.f32 %v827_v3 }
 0x363   :  { %v755_v51 = vpop.xlane.xlu0 %754  ;;  %871 = vadd.xlane.f32.xlu1 %v1459_v49 }
 0x364   :  { %v1461_v55 = vpop.eup %1460  ;;  %v2037_v56 = vsub.f32 %v1937_v12, %v755_v51 }
 0x365   :  { %v757_v6 = vpop.xlane.xlu1 %756  ;;  %873 = vadd.xlane.f32.xlu0 %v1461_v55 }
 0x366   :  { %v829_v58 = vmul.f32 1.442695, %v2037_v56  ;;  %v2041_v59 = vsub.f32 %v1940_v15, %v757_v6 }
 0x368   :  { %1466 = vpow2.f32 %v829_v58  ;;  %v831_v9 = vmul.f32 1.442695, %v2041_v59 }
 0x36a   :  { %v1463_v62 = vpop.eup %1462  ;;  %1468 = vpow2.f32 %v831_v9 }
 0x36b   :  { %v759_v1 = vpop.xlane.xlu0 %758  ;;  %875 = vadd.xlane.f32.xlu1 %v1463_v62 }
 0x36c   :  { %v1465_v4 = vpop.eup %1464  ;;  %v2045_v38 = vsub.f32 %v1945_v18, %v759_v1 }
 0x36d   :  { %v761_v12 = vpop.xlane.xlu1 %760  ;;  %877 = vadd.xlane.f32.xlu0 %v1465_v4 }
 0x36e   :  { %v833_v7 = vmul.f32 1.442695, %v2045_v38  ;;  %v2049_v8 = vsub.f32 %v1948_v22, %v761_v12 }
 0x370   :  { %1470 = vpow2.f32 %v833_v7  ;;  %v835_v15 = vmul.f32 1.442695, %v2049_v8 }
 0x372   :  { %v1467_v10 = vpop.eup %1466  ;;  %1472 = vpow2.f32 %v835_v15 }
 0x373   :  { %v763_v11 = vpop.xlane.xlu0 %762  ;;  %879 = vadd.xlane.f32.xlu1 %v1467_v10 }
 0x374   :  { %v1469_v13 = vpop.eup %1468  ;;  %v2053_v14 = vsub.f32 %v1953_v26, %v763_v11 }
 0x375   :  { %v765_v18 = vpop.xlane.xlu1 %764  ;;  %881 = vadd.xlane.f32.xlu0 %v1469_v13 }
 0x376   :  { %v837_v16 = vmul.f32 1.442695, %v2053_v14  ;;  %v2057_v20 = vsub.f32 %v1956_v30, %v765_v18 }
 0x378   :  { %1474 = vpow2.f32 %v837_v16  ;;  %v839_v22 = vmul.f32 1.442695, %v2057_v20 }
 0x37a   :  { %v1471_v46 = vpop.eup %1470  ;;  %1476 = vpow2.f32 %v839_v22 }
 0x37b   :  { %v767_v19 = vpop.xlane.xlu0 %766  ;;  %883 = vadd.xlane.f32.xlu1 %v1471_v46 }
 0x37c   :  { %v1473_v21 = vpop.eup %1472  ;;  %v2061_v50 = vsub.f32 %v1961_v33, %v767_v19 }
 0x37d   :  { %v769_v26 = vpop.xlane.xlu1 %768  ;;  %885 = vadd.xlane.f32.xlu0 %v1473_v21 }
 0x37e   :  { %v841_v25 = vmul.f32 1.442695, %v2061_v50  ;;  %v2065_v27 = vsub.f32 %v1964_v36, %v769_v26 }
 0x380   :  { %1478 = vpow2.f32 %v841_v25  ;;  %v843_v30 = vmul.f32 1.442695, %v2065_v27 }
 0x382   :  { %v1475_v54 = vpop.eup %1474  ;;  %1480 = vpow2.f32 %v843_v30 }
 0x383   :  { %v771_v31 = vpop.xlane.xlu0 %770  ;;  %887 = vadd.xlane.f32.xlu1 %v1475_v54 }
 0x384   :  { %v1477_v32 = vpop.eup %1476  ;;  %v2069_v34 = vsub.f32 %v1969_v40, %v771_v31 }
 0x385   :  { %v773_v33 = vpop.xlane.xlu1 %772  ;;  %889 = vadd.xlane.f32.xlu0 %v1477_v32 }
 0x386   :  { %v845_v57 = vmul.f32 1.442695, %v2069_v34  ;;  %v2073_v37 = vsub.f32 %v1972_v45, %v773_v33 }
 0x388   :  { %1482 = vpow2.f32 %v845_v57  ;;  %v847_v36 = vmul.f32 1.442695, %v2073_v37 }
 0x38a   :  { %v1479_v60 = vpop.eup %1478  ;;  %1484 = vpow2.f32 %v847_v36 }
 0x38b   :  { %v775_v41 = vpop.xlane.xlu0 %774  ;;  %891 = vadd.xlane.f32.xlu1 %v1479_v60 }
 0x38c   :  { %v1481_v43 = vpop.eup %1480  ;;  %v2077_v47 = vsub.f32 %v1977_v0, %v775_v41 }
 0x38d   :  { %v777_v40 = vpop.xlane.xlu1 %776  ;;  %893 = vadd.xlane.f32.xlu0 %v1481_v43 }
 0x38e   :  { %v849_v63 = vmul.f32 1.442695, %v2077_v47  ;;  %v2081_v24 = vsub.f32 %v1980_v42, %v777_v40 }
 0x390   :  { %1486 = vpow2.f32 %v849_v63  ;;  %v851_v45 = vmul.f32 1.442695, %v2081_v24 }
 0x392   :  { %v1483_v3 = vpop.eup %1482  ;;  %1488 = vpow2.f32 %v851_v45 }
 0x393   :  { %895 = vadd.xlane.f32.xlu1 %v1483_v3  ;;  %v779_v49 = vpop.xlane.xlu0 %778 }
 0x394   :  { %v1485_v51 = vpop.eup %1484  ;;  %v2085_v55 = vsub.f32 %v1985_v53, %v779_v49 }
 0x395   :  { %897 = vadd.xlane.f32.xlu0 %v1485_v51 }
 0x396   :  { %v853_v0 = vmul.f32 1.442695, %v2085_v55 }
 0x398   :  { %1490 = vpow2.f32 %v853_v0 }
 0x39a   :  { %v1487_v6 = vpop.eup %1486 }
 0x39b   :  { %899 = vadd.xlane.f32.xlu1 %v1487_v6 }
 0x39c   :  { %v1489_v58 = vpop.eup %1488 }
 0x39d   :  { %901 = vadd.xlane.f32.xlu0 %v1489_v58 }
 0x3a2   :  { %v1491_v42 = vpop.eup %1490 }
 0x3a3   :  { %903 = vadd.xlane.f32.xlu1 %v1491_v42 }
 0x3d0   :  { %v856_v9 = vpop.xlane.xlu1 %855 }
 0x3d1   :  { %1492 = vlog2.f32 %v856_v9 }
 0x3d4   :  { %v858_v62 = vpop.xlane.xlu0 %857 }
 0x3d5   :  { %1494 = vlog2.f32 %v858_v62 }
 0x3d8   :  { %v860_v1 = vpop.xlane.xlu1 %859 }
 0x3d9   :  { %1496 = vlog2.f32 %v860_v1 }
 0x3db   :  { %v1493_v4 = vpop.eup %1492 }
 0x3dc   :  { %v906_v12 = vmul.f32 0.6931472, %v1493_v4  ;;  %v862_v53 = vpop.xlane.xlu0 %861 }
 0x3dd   :  { %1498 = vlog2.f32 %v862_v53 }
 0x3de   :  { %v955_v7 = vsub.f32 %v1989_v61, %v906_v12 }
 0x3df   :  { %v1495_v15 = vpop.eup %1494 }
 0x3e0   :  { %981 = vst.msk [vmem:[%s2216_s3] sm:$0xff] %vm980_vm2, %v955_v7  ;;  %v908_v10 = vmul.f32 0.6931472, %v1495_v15  ;;  %v864_v11 = vpop.xlane.xlu1 %863 }
 0x3e1   :  { %1500 = vlog2.f32 %v864_v11 }
 0x3e2   :  { %v956_v13 = vsub.f32 %v1993_v2, %v908_v10  ;;  %v866_v18 = vpop.xlane.xlu0 %865 }
 0x3e3   :  { %v1497_v16 = vpop.eup %1496  ;;  %1502 = vlog2.f32 %v866_v18 }
 0x3e4   :  { %982 = vst.msk [vmem:[%s2216_s3 + $0x8] sm:$0xff] %vm980_vm2, %v956_v13  ;;  %v910_v61 = vmul.f32 0.6931472, %v1497_v16 }
 0x3e6   :  { %v957_v22 = vsub.f32 %v1997_v5, %v910_v61 }
 0x3e7   :  { %v1499_v46 = vpop.eup %1498 }
 0x3e8   :  { %983 = vst.msk [vmem:[%s2216_s3 + $0x10] sm:$0xff] %vm980_vm2, %v957_v22  ;;  %v912_v19 = vmul.f32 0.6931472, %v1499_v46  ;;  %v868_v21 = vpop.xlane.xlu1 %867 }
 0x3e9   :  { %1504 = vlog2.f32 %v868_v21 }
 0x3ea   :  { %v958_v2 = vsub.f32 %v2001_v44, %v912_v19  ;;  %v870_v26 = vpop.xlane.xlu0 %869 }
 0x3eb   :  { %v1501_v25 = vpop.eup %1500  ;;  %1506 = vlog2.f32 %v870_v26 }
 0x3ec   :  { %984 = vst.msk [vmem:[%s2216_s3 + $0x18] sm:$0xff] %vm980_vm2, %v958_v2  ;;  %v914_v5 = vmul.f32 0.6931472, %v1501_v25 }
 0x3ed   :  { %v1503_v30 = vpop.eup %1502 }
 0x3ee   :  { %v959_v54 = vsub.f32 %v2005_v52, %v914_v5  ;;  %v916_v31 = vmul.f32 0.6931472, %v1503_v30 }
 0x3f0   :  { %985 = vst.msk [vmem:[%s2216_s3 + $0x20] sm:$0xff] %vm980_vm2, %v959_v54  ;;  %v960_v44 = vsub.f32 %v2009_v17, %v916_v31  ;;  %v872_v32 = vpop.xlane.xlu1 %871 }
 0x3f1   :  { %1508 = vlog2.f32 %v872_v32 }
 0x3f2   :  { %986 = vst.msk [vmem:[%s2216_s3 + $0x28] sm:$0xff] %vm980_vm2, %v960_v44  ;;  %v874_v33 = vpop.xlane.xlu0 %873 }
 0x3f3   :  { %v1505_v57 = vpop.eup %1504  ;;  %1510 = vlog2.f32 %v874_v33 }
 0x3f4   :  { %v918_v36 = vmul.f32 0.6931472, %v1505_v57 }
 0x3f5   :  { %v1507_v52 = vpop.eup %1506 }
 0x3f6   :  { %v961_v60 = vsub.f32 %v2013_v23, %v918_v36  ;;  %v920_v41 = vmul.f32 0.6931472, %v1507_v52 }
 0x3f8   :  { %987 = vst.msk [vmem:[%s2216_s3 + $0x30] sm:$0xff] %vm980_vm2, %v961_v60  ;;  %v962_v17 = vsub.f32 %v2017_v29, %v920_v41  ;;  %v876_v43 = vpop.xlane.xlu1 %875 }
 0x3f9   :  { %1512 = vlog2.f32 %v876_v43 }
 0x3fa   :  { %988 = vst.msk [vmem:[%s2216_s3 + $0x38] sm:$0xff] %vm980_vm2, %v962_v17  ;;  %v878_v40 = vpop.xlane.xlu0 %877 }
 0x3fb   :  { %v1509_v63 = vpop.eup %1508  ;;  %1514 = vlog2.f32 %v878_v40 }
 0x3fc   :  { %v922_v45 = vmul.f32 0.6931472, %v1509_v63 }
 0x3fd   :  { %v1511_v23 = vpop.eup %1510 }
 0x3fe   :  { %v963_v3 = vsub.f32 %v2021_v35, %v922_v45  ;;  %v924_v49 = vmul.f32 0.6931472, %v1511_v23 }
 0x400   :  { %989 = vst.msk [vmem:[%s2216_s3 + $0x40] sm:$0xff] %vm980_vm2, %v963_v3  ;;  %v964_v29 = vsub.f32 %v2025_v39, %v924_v49  ;;  %v880_v51 = vpop.xlane.xlu1 %879 }
 0x401   :  { %1516 = vlog2.f32 %v880_v51 }
 0x402   :  { %990 = vst.msk [vmem:[%s2216_s3 + $0x48] sm:$0xff] %vm980_vm2, %v964_v29  ;;  %v882_v0 = vpop.xlane.xlu0 %881 }
 0x403   :  { %v1513_v6 = vpop.eup %1512  ;;  %1518 = vlog2.f32 %v882_v0 }
 0x404   :  { %v926_v58 = vmul.f32 0.6931472, %v1513_v6 }
 0x405   :  { %v1515_v35 = vpop.eup %1514 }
 0x406   :  { %v965_v42 = vsub.f32 %v2029_v48, %v926_v58  ;;  %v928_v9 = vmul.f32 0.6931472, %v1515_v35 }
 0x408   :  { %991 = vst.msk [vmem:[%s2216_s3 + $0x50] sm:$0xff] %vm980_vm2, %v965_v42  ;;  %v966_v39 = vsub.f32 %v2033_v28, %v928_v9  ;;  %v884_v62 = vpop.xlane.xlu1 %883 }
 0x409   :  { %1520 = vlog2.f32 %v884_v62 }
 0x40a   :  { %992 = vst.msk [vmem:[%s2216_s3 + $0x58] sm:$0xff] %vm980_vm2, %v966_v39  ;;  %v886_v1 = vpop.xlane.xlu0 %885 }
 0x40b   :  { %v1517_v4 = vpop.eup %1516  ;;  %1522 = vlog2.f32 %v886_v1 }
 0x40c   :  { %v930_v12 = vmul.f32 0.6931472, %v1517_v4 }
 0x40d   :  { %v1519_v48 = vpop.eup %1518 }
 0x40e   :  { %v967_v53 = vsub.f32 %v2037_v56, %v930_v12  ;;  %v932_v7 = vmul.f32 0.6931472, %v1519_v48 }
 0x410   :  { %993 = vst.msk [vmem:[%s2216_s3 + $0x60] sm:$0xff] %vm980_vm2, %v967_v53  ;;  %v968_v28 = vsub.f32 %v2041_v59, %v932_v7  ;;  %v888_v15 = vpop.xlane.xlu1 %887 }
 0x411   :  { %1524 = vlog2.f32 %v888_v15 }
 0x412   :  { %994 = vst.msk [vmem:[%s2216_s3 + $0x68] sm:$0xff] %vm980_vm2, %v968_v28  ;;  %v890_v10 = vpop.xlane.xlu0 %889 }
 0x413   :  { %v1521_v11 = vpop.eup %1520  ;;  %1526 = vlog2.f32 %v890_v10 }
 0x414   :  { %v934_v13 = vmul.f32 0.6931472, %v1521_v11 }
 0x415   :  { %v1523_v56 = vpop.eup %1522 }
 0x416   :  { %v969_v18 = vsub.f32 %v2045_v38, %v934_v13  ;;  %v936_v16 = vmul.f32 0.6931472, %v1523_v56 }
 0x418   :  { %995 = vst.msk [vmem:[%s2216_s3 + $0x70] sm:$0xff] %vm980_vm2, %v969_v18  ;;  %v970_v59 = vsub.f32 %v2049_v8, %v936_v16  ;;  %v892_v61 = vpop.xlane.xlu1 %891 }
 0x419   :  { %1528 = vlog2.f32 %v892_v61 }
 0x41a   :  { %996 = vst.msk [vmem:[%s2216_s3 + $0x78] sm:$0xff] %vm980_vm2, %v970_v59  ;;  %v894_v22 = vpop.xlane.xlu0 %893 }
 0x41b   :  { %v1525_v46 = vpop.eup %1524  ;;  %1530 = vlog2.f32 %v894_v22 }
 0x41c   :  { %v938_v19 = vmul.f32 0.6931472, %v1525_v46 }
 0x41d   :  { %v1527_v38 = vpop.eup %1526 }
 0x41e   :  { %v971_v21 = vsub.f32 %v2053_v14, %v938_v19  ;;  %v940_v2 = vmul.f32 0.6931472, %v1527_v38 }
 0x420   :  { %997 = vst.msk [vmem:[%s2216_s3 + $0x80] sm:$0xff] %vm980_vm2, %v971_v21  ;;  %v972_v8 = vsub.f32 %v2057_v20, %v940_v2  ;;  %v896_v26 = vpop.xlane.xlu1 %895 }
 0x421   :  { %1532 = vlog2.f32 %v896_v26 }
 0x422   :  { %998 = vst.msk [vmem:[%s2216_s3 + $0x88] sm:$0xff] %vm980_vm2, %v972_v8  ;;  %v898_v25 = vpop.xlane.xlu0 %897 }
 0x423   :  { %v1529_v5 = vpop.eup %1528  ;;  %1534 = vlog2.f32 %v898_v25 }
 0x424   :  { %v942_v30 = vmul.f32 0.6931472, %v1529_v5 }
 0x425   :  { %v1531_v14 = vpop.eup %1530 }
 0x426   :  { %v973_v54 = vsub.f32 %v2061_v50, %v942_v30  ;;  %v944_v31 = vmul.f32 0.6931472, %v1531_v14 }
 0x428   :  { %999 = vst.msk [vmem:[%s2216_s3 + $0x90] sm:$0xff] %vm980_vm2, %v973_v54  ;;  %v974_v20 = vsub.f32 %v2065_v27, %v944_v31  ;;  %v900_v44 = vpop.xlane.xlu1 %899 }
 0x429   :  { %1536 = vlog2.f32 %v900_v44 }
 0x42a   :  { %1000 = vst.msk [vmem:[%s2216_s3 + $0x98] sm:$0xff] %vm980_vm2, %v974_v20  ;;  %v902_v32 = vpop.xlane.xlu0 %901 }
 0x42b   :  { %v1533_v33 = vpop.eup %1532  ;;  %1538 = vlog2.f32 %v902_v32 }
 0x42c   :  { %v946_v57 = vmul.f32 0.6931472, %v1533_v33 }
 0x42d   :  { %v1535_v50 = vpop.eup %1534 }
 0x42e   :  { %v975_v36 = vsub.f32 %v2069_v34, %v946_v57  ;;  %v948_v52 = vmul.f32 0.6931472, %v1535_v50 }
 0x430   :  { %1001 = vst.msk [vmem:[%s2216_s3 + $0xa0] sm:$0xff] %vm980_vm2, %v975_v36  ;;  %v976_v27 = vsub.f32 %v2073_v37, %v948_v52  ;;  %v904_v60 = vpop.xlane.xlu1 %903 }
 0x431   :  { %1540 = vlog2.f32 %v904_v60 }
 0x432   :  { %1002 = vst.msk [vmem:[%s2216_s3 + $0xa8] sm:$0xff] %vm980_vm2, %v976_v27 }
 0x433   :  { %v1537_v41 = vpop.eup %1536 }
 0x434   :  { %v950_v17 = vmul.f32 0.6931472, %v1537_v41 }
 0x435   :  { %v1539_v43 = vpop.eup %1538 }
 0x436   :  { %v977_v34 = vsub.f32 %v2077_v47, %v950_v17  ;;  %v952_v40 = vmul.f32 0.6931472, %v1539_v43 }
 0x438   :  { %1003 = vst.msk [vmem:[%s2216_s3 + $0xb0] sm:$0xff] %vm980_vm2, %v977_v34  ;;  %v978_v37 = vsub.f32 %v2081_v24, %v952_v40 }
 0x43a   :  { %1004 = vst.msk [vmem:[%s2216_s3 + $0xb8] sm:$0xff] %vm980_vm2, %v978_v37 }
 0x43b   :  { %v1541_v63 = vpop.eup %1540 }
 0x43c   :  { %v954_v45 = vmul.f32 0.6931472, %v1541_v63 }
 0x43e   :  { %v979_v23 = vsub.f32 %v2085_v55, %v954_v45 }
 0x440   :  { %1005 = vst.msk [vmem:[%s2216_s3 + $0xc0] sm:$0xff] %vm980_vm2, %v979_v23 }

</bundles_post_ra>
